<compile_context>
chip_gen: v7x
topology: tpu7x:2x2x1
jax: 0.10.0
libtpu: 0.0.40
codegen_flags: <defaults>
</compile_context>

<pallas_src>
import functools

import jax
import jax.numpy as jnp
from jax import lax
from jax.experimental import pallas as pl
from jax.experimental.pallas import tpu as pltpu


def _round_up(a, b):
    return ((a + b - 1) // b) * b


def _default_tile():
    """256 on 256-wide-MXU generations (v6e / v7x), 128 otherwise (v5e, ...)."""
    try:
        kind = jax.devices()[0].device_kind.lower()
    except Exception:
        return 128
    return 256 if any(t in kind for t in ("v6", "v7", "7x")) else 128


def _sa_flash_kernel(C, yq_ref, xres_ref, z_ref, v_ref, g_ref, o_ref, m_s, acc_s):
    """One (batch, query-tile, key-tile) step of masked self-attention.

    yq_ref  : (1, C_pad, TQ) bf16  masked + augmented x, query columns
    xres_ref: (1, C,     TQ) f32   raw x, query columns (residual)
    z_ref   : (1, C_pad, TK) bf16  W_e @ (x_aug*mask), key columns
    v_ref   : (1, C_pad, TK) bf16  [Wv x + bv ; valid ; 0...], key columns
    g_ref   : (1,) f32 in SMEM     gamma
    o_ref   : (1, C, TQ)           output tile (resident across the key axis)
    m_s     : (1, TQ) f32          running max
    acc_s   : (C_pad, TQ) f32      unnormalized output; row C is the denominator
    """
    ki = pl.program_id(2)

    @pl.when(ki == 0)
    def _():
        m_s[...] = jnp.full(m_s.shape, -jnp.inf, m_s.dtype)
        acc_s[...] = jnp.zeros(acc_s.shape, acc_s.dtype)

    # Energy tile, key-major: e[j, i] = energy[q_i, k_j].  bf16 operands,
    # f32 accumulation; contraction depth is the folded channel axis C_pad.
    e = lax.dot_general(z_ref[0], yq_ref[0], (((0,), (0,)), ((), ())),
                        preferred_element_type=jnp.float32)            # (TK, TQ)

    # Online softmax over the key axis (axis 0); elementwise math stays f32
    # (v6e/v7x option: bf16 exp to halve EUP pushes; kept f32 for v5e accuracy).
    m_prev = m_s[...]
    m_new = jnp.maximum(m_prev, jnp.max(e, axis=0, keepdims=True))     # (1, TQ)
    alpha = jnp.exp(m_prev - m_new)                                    # (1, TQ)
    p = jnp.exp(e - m_new).astype(v_ref.dtype)                         # (TK, TQ) bf16

    # PV matmul; v carries a "valid"-ones row, so row C of the accumulator is
    # the softmax denominator (padded key columns contribute exactly zero).
    acc_s[...] = alpha * acc_s[...] + jnp.dot(v_ref[0], p,
                                              preferred_element_type=jnp.float32)
    m_s[...] = m_new

    @pl.when(ki == pl.num_programs(2) - 1)
    def _():
        inv_l = pl.reciprocal(acc_s[C:C + 1, :], approx=False)         # (1, TQ)
        o_ref[0] = (g_ref[0] * (acc_s[:C, :] * inv_l)
                    + xres_ref[0]).astype(o_ref.dtype)


def sa_block(x, mask, wq, bq, wk, bk, wv, bv, gamma, *,
             tile=None, max_resident_keys=1024):
    """x: (B, C, H, W), mask: (B, 1, H, W). Returns (B, C, H, W)."""
    B, C, H, W = x.shape
    N = H * W
    f32, bf16 = jnp.float32, jnp.bfloat16

    # Augmented channels: C real rows + 1 bias/"valid" row, rounded up to a
    # multiple of 16 so the bf16 operands stay sublane-tile aligned.
    C_pad = _round_up(C + 1, 16)

    # ---- tiles / padded sequence length ------------------------------------
    TQ = tile if tile is not None else _default_tile()
    TQ = max(128, min(TQ, _round_up(N, 128)))
    N_pad = _round_up(N, TQ)
    if B * (N_pad // TQ) < 2 and TQ > 128:     # keep both v7x TensorCores busy
        TQ //= 2
    num_q = N_pad // TQ

    # Key-side residency: for moderate N keep the whole key axis in one block
    # so z/v are DMA'd once per batch and reused across all query tiles.
    TK = N_pad if N_pad <= max(max_resident_keys, TQ) else TQ
    num_k = N_pad // TK

    # ---- wrapper-side (query-tile-invariant) projections --------------------
    xp = jnp.pad(x.reshape(B, C, N).astype(f32), ((0, 0), (0, 0), (0, N_pad - N)))
    mp = jnp.pad(mask.reshape(B, 1, N).astype(f32), ((0, 0), (0, 0), (0, N_pad - N)))
    valid = (jnp.arange(N_pad) < N).astype(f32)                        # (N_pad,)
    valid_row = jnp.broadcast_to(valid[None, None, :], (B, 1, N_pad))
    zrows = jnp.zeros((B, C_pad - C - 1, N_pad), f32)

    # x augmented with a bias lane ("valid", so padded columns stay all-zero).
    x_aug = jnp.concatenate([xp, valid_row, zrows], axis=1)            # (B,C_pad,N_pad)
    yq = x_aug * mp                                                    # masked (q & k)

    def aug_w(w, b):
        out_dim = w.shape[0]
        return jnp.concatenate(
            [w.astype(f32), b.reshape(-1, 1).astype(f32),
             jnp.zeros((out_dim, C_pad - C - 1), f32)], axis=1)

    w_e = jnp.dot(aug_w(wq, bq).T, aug_w(wk, bk))                      # (C_pad, C_pad)
    z = jnp.einsum('oc,bcn->bon', w_e, yq)                             # (B,C_pad,N_pad)
    v = jnp.einsum('oc,bcn->bon', aug_w(wv, bv), x_aug)                # (B,C,  N_pad)
    v_full = jnp.concatenate([v, valid_row, zrows], axis=1)            # (B,C_pad,N_pad)

    # bf16 only on the MXU operands; accumulation and softmax stay f32.
    yq_b, z_b, v_b = yq.astype(bf16), z.astype(bf16), v_full.astype(bf16)
    g1 = jnp.asarray(gamma, f32).reshape(1)

    # ---- pallas_call ---------------------------------------------------------
    key_kwargs = dict(pipeline_mode=pl.Buffered(3)) if num_k > 2 else {}
    z_spec = pl.BlockSpec((1, C_pad, TK), lambda b, qi, ki: (b, 0, ki), **key_kwargs)
    v_spec = pl.BlockSpec((1, C_pad, TK), lambda b, qi, ki: (b, 0, ki), **key_kwargs)

    out_f = pl.pallas_call(
        functools.partial(_sa_flash_kernel, C),
        out_shape=jax.ShapeDtypeStruct((B, C, N_pad), f32),
        grid_spec=pltpu.PrefetchScalarGridSpec(
            num_scalar_prefetch=0,
            grid=(B, num_q, num_k),
            in_specs=[
                pl.BlockSpec((1, C_pad, TQ), lambda b, qi, ki: (b, 0, qi)),  # yq (q)
                pl.BlockSpec((1, C, TQ), lambda b, qi, ki: (b, 0, qi)),      # residual
                z_spec,                                                      # keys: z
                v_spec,                                                      # keys: v
                pl.BlockSpec(memory_space=pltpu.MemorySpace.SMEM),           # gamma
            ],
            out_specs=pl.BlockSpec((1, C, TQ), lambda b, qi, ki: (b, 0, qi)),
            scratch_shapes=[
                pltpu.VMEM((1, TQ), f32),        # running max
                pltpu.VMEM((C_pad, TQ), f32),    # unnormalized out + denom row
            ],
        ),
        compiler_params=pltpu.CompilerParams(
            dimension_semantics=("parallel", "parallel", "arbitrary"),
            vmem_limit_bytes=32 * 1024 * 1024,
        ),
    )(yq_b, xp, z_b, v_b, g1)

    return out_f[..., :N].reshape(B, C, H, W).astype(x.dtype)


def sa_block_ref(x, mask, wq, bq, wk, bk, wv, bv, gamma):
    """Pure-JAX f32 reference mirroring the PyTorch forward."""
    B, C, H, W = x.shape
    N = H * W
    xf = x.reshape(B, C, N)
    mf = mask.reshape(B, 1, N)
    q = jnp.einsum('oc,bcn->bon', wq, xf) + bq[None, :, None]
    k = jnp.einsum('oc,bcn->bon', wk, xf) + bk[None, :, None]
    q = q * mf
    k = k * mf
    energy = jnp.einsum('bci,bcj->bij', q, k)
    attn = jax.nn.softmax(energy, axis=-1)
    v = jnp.einsum('oc,bcn->bon', wv, xf) + bv[None, :, None]
    out = jnp.einsum('bcj,bij->bci', v, attn)
    return gamma * out.reshape(B, C, H, W) + x


if __name__ == "__main__":
    B, C, H, W = 2, 32, 16, 16          # in_dim=32 -> C//8 = 4, N = 256
    C8 = C // 8

    key = jax.random.PRNGKey(0)
    k_x, k_m, k_wq, k_bq, k_wk, k_bk, k_wv, k_bv = jax.random.split(key, 8)

    x = jax.random.normal(k_x, (B, C, H, W), jnp.float32)
    mask = (jax.random.uniform(k_m, (B, 1, H, W)) > 0.3).astype(jnp.float32)

    wq = 0.1 * jax.random.normal(k_wq, (C8, C), jnp.float32)
    bq = 0.1 * jax.random.normal(k_bq, (C8,), jnp.float32)
    wk = 0.1 * jax.random.normal(k_wk, (C8, C), jnp.float32)
    bk = 0.1 * jax.random.normal(k_bk, (C8,), jnp.float32)
    wv = 0.1 * jax.random.normal(k_wv, (C, C), jnp.float32)
    bv = 0.1 * jax.random.normal(k_bv, (C,), jnp.float32)
    gamma = jnp.float32(1.0)            # nn.Parameter(torch.ones(1))

    # bf16 MXU operands give ~1e-3-level absolute error vs. the f32 reference,
    # so the tolerance is set to 5e-3 (f32 accumulation, f32 softmax math).
    ATOL = RTOL = 5e-3
    ref = sa_block_ref(x, mask, wq, bq, wk, bk, wv, bv, gamma)

    # 1) Generation-default tiles (256 on v6e/v7x, 128 on v5e), resident keys.
    out = jax.block_until_ready(sa_block(x, mask, wq, bq, wk, bk, wv, bv, gamma))
    assert out.shape == (B, C, H, W)
    assert jnp.allclose(out, ref, atol=ATOL, rtol=RTOL), \
        f"max err {jnp.max(jnp.abs(out - ref))}"

    # 2) Force 128-wide tiles and a tiled key axis -> exercises the online-
    #    softmax accumulation across key tiles (grid (2, 2, 2)).
    out2 = jax.block_until_ready(
        sa_block(x, mask, wq, bq, wk, bk, wv, bv, gamma,
                 tile=128, max_resident_keys=0))
    assert jnp.allclose(out2, ref, atol=ATOL, rtol=RTOL), \
        f"max err {jnp.max(jnp.abs(out2 - ref))}"

    # 3) Non-128-multiple spatial size (N = 100) -> exercises the padded last
    #    tile that replaces the old TK=N single-huge-tile fallback.
    H2 = W2 = 10
    x3 = jax.random.normal(k_x, (B, C, H2, W2), jnp.float32)
    m3 = (jax.random.uniform(k_m, (B, 1, H2, W2)) > 0.3).astype(jnp.float32)
    ref3 = sa_block_ref(x3, m3, wq, bq, wk, bk, wv, bv, gamma)
    out3 = jax.block_until_ready(sa_block(x3, m3, wq, bq, wk, bk, wv, bv, gamma))
    assert jnp.allclose(out3, ref3, atol=ATOL, rtol=RTOL), \
        f"max err {jnp.max(jnp.abs(out3 - ref3))}"

    print("KERNEL_OK")
</pallas_src>

<mosaic_0001>
module attributes {stable_mosaic.version = 11 : i64} {
  func.func @_sa_flash_kernel(%arg0: i32, %arg1: i32, %arg2: i32, %arg3: memref<1x48x128xbf16, #tpu.memory_space<vmem>>, %arg4: memref<1x32x128xf32, #tpu.memory_space<vmem>>, %arg5: memref<1x48x256xbf16, #tpu.memory_space<vmem>>, %arg6: memref<1x48x256xbf16, #tpu.memory_space<vmem>>, %arg7: memref<1xf32, #tpu.memory_space<smem>>, %arg8: memref<1x32x128xf32, #tpu.memory_space<vmem>>, %arg9: memref<1x128xf32, #tpu.memory_space<vmem>>, %arg10: memref<48x128xf32, #tpu.memory_space<vmem>>) attributes {dimension_semantics = [#tpu.dimension_semantics<parallel>, #tpu.dimension_semantics<parallel>, #tpu.dimension_semantics<arbitrary>], iteration_bounds = array<i64: 2, 2, 1>, scalar_prefetch = 0 : i64, scratch_operands = 2 : i64, tpu.core_type = #tpu.core_type<tc>, window_params = [{transform_indices = @transform_0, window_bounds = array<i64: 1, 48, 128>}, {transform_indices = @transform_1, window_bounds = array<i64: 1, 32, 128>}, {transform_indices = @transform_2, window_bounds = array<i64: 1, 48, 256>}, {transform_indices = @transform_3, window_bounds = array<i64: 1, 48, 256>}, {transform_indices = @transform_4, window_bounds = array<i64: 1>}, {transform_indices = @transform_5, window_bounds = array<i64: 1, 32, 128>}]} {
    %c0_i32 = arith.constant 0 : i32
    %0 = arith.cmpi eq, %arg2, %c0_i32 : i32
    %1 = arith.extui %0 : i1 to i32
    %c0_i32_0 = arith.constant 0 : i32
    %2 = arith.cmpi ne, %1, %c0_i32_0 : i32
    scf.if %2 {
      %cst_21 = arith.constant 0xFF800000 : f32
      %30 = vector.broadcast %cst_21 : f32 to vector<1x128xf32>
      %c0_22 = arith.constant 0 : index
      %c0_23 = arith.constant 0 : index
      %31 = vector.load %arg9[%c0_22, %c0_23] : memref<1x128xf32, #tpu.memory_space<vmem>>, vector<1x128xf32>
      tpu.vector_store %arg9[%c0_22, %c0_23], %30 {strides = array<i32>} : memref<1x128xf32, #tpu.memory_space<vmem>>, vector<1x128xf32>,
      %cst_24 = arith.constant 0.000000e+00 : f32
      %32 = vector.broadcast %cst_24 : f32 to vector<48x128xf32>
      %c0_25 = arith.constant 0 : index
      %c0_26 = arith.constant 0 : index
      %33 = vector.load %arg10[%c0_25, %c0_26] : memref<48x128xf32, #tpu.memory_space<vmem>>, vector<48x128xf32>
      tpu.vector_store %arg10[%c0_25, %c0_26], %32 {strides = array<i32>} : memref<48x128xf32, #tpu.memory_space<vmem>>, vector<48x128xf32>,
    } else {
    }
    %c0 = arith.constant 0 : index
    %c0_1 = arith.constant 0 : index
    %c0_2 = arith.constant 0 : index
    %3 = vector.load %arg5[%c0, %c0_1, %c0_2] : memref<1x48x256xbf16, #tpu.memory_space<vmem>>, vector<1x48x256xbf16>
    %4 = vector.shape_cast %3 : vector<1x48x256xbf16> to vector<48x256xbf16>
    %c0_3 = arith.constant 0 : index
    %c0_4 = arith.constant 0 : index
    %c0_5 = arith.constant 0 : index
    %5 = vector.load %arg3[%c0_3, %c0_4, %c0_5] : memref<1x48x128xbf16, #tpu.memory_space<vmem>>, vector<1x48x128xbf16>
    %6 = vector.shape_cast %5 : vector<1x48x128xbf16> to vector<48x128xbf16>
    %cst = arith.constant dense<0.000000e+00> : vector<256x128xf32>
    %7 = tpu.matmul %4, %6, %cst {dimension_numbers = #tpu.dot_dimension_numbers<[0], [0], [1], [1], [0, 1, 1, 1], [], []>} : vector<48x256xbf16>, vector<48x128xbf16>, vector<256x128xf32> -> vector<256x128xf32>
    %c0_6 = arith.constant 0 : index
    %c0_7 = arith.constant 0 : index
    %8 = vector.load %arg9[%c0_6, %c0_7] : memref<1x128xf32, #tpu.memory_space<vmem>>, vector<1x128xf32>
    %cst_8 = arith.constant dense<0xFF800000> : vector<128xf32>
    %9 = vector.multi_reduction <maximumf>, %7, %cst_8 [0] : vector<256x128xf32> to vector<128xf32>
    %10 = vector.shape_cast %9 : vector<128xf32> to vector<1x128xf32>
    %11 = arith.maximumf %8, %10 : vector<1x128xf32>
    %12 = arith.subf %8, %11 : vector<1x128xf32>
    %13 = math.exp %12 : vector<1x128xf32>
    %14 = vector.broadcast %11 : vector<1x128xf32> to vector<256x128xf32>
    %15 = arith.subf %7, %14 : vector<256x128xf32>
    %16 = math.exp %15 : vector<256x128xf32>
    %17 = arith.truncf %16 : vector<256x128xf32> to vector<256x128xbf16>
    %c0_9 = arith.constant 0 : index
    %c0_10 = arith.constant 0 : index
    %18 = vector.load %arg10[%c0_9, %c0_10] : memref<48x128xf32, #tpu.memory_space<vmem>>, vector<48x128xf32>
    %19 = vector.broadcast %13 : vector<1x128xf32> to vector<48x128xf32>
    %20 = arith.mulf %19, %18 : vector<48x128xf32>
    %c0_11 = arith.constant 0 : index
    %c0_12 = arith.constant 0 : index
    %c0_13 = arith.constant 0 : index
    %21 = vector.load %arg6[%c0_11, %c0_12, %c0_13] : memref<1x48x256xbf16, #tpu.memory_space<vmem>>, vector<1x48x256xbf16>
    %22 = vector.shape_cast %21 : vector<1x48x256xbf16> to vector<48x256xbf16>
    %cst_14 = arith.constant dense<0.000000e+00> : vector<48x128xf32>
    %23 = tpu.matmul %22, %17, %cst_14 {dimension_numbers = #tpu.dot_dimension_numbers<[1], [0], [0], [1], [0, 0, 1, 1], [], []>} : vector<48x256xbf16>, vector<256x128xbf16>, vector<48x128xf32> -> vector<48x128xf32>
    %24 = arith.addf %20, %23 : vector<48x128xf32>
    %c0_15 = arith.constant 0 : index
    %c0_16 = arith.constant 0 : index
    %25 = vector.load %arg10[%c0_15, %c0_16] : memref<48x128xf32, #tpu.memory_space<vmem>>, vector<48x128xf32>
    tpu.vector_store %arg10[%c0_15, %c0_16], %24 {strides = array<i32>} : memref<48x128xf32, #tpu.memory_space<vmem>>, vector<48x128xf32>,
    %c0_17 = arith.constant 0 : index
    %c0_18 = arith.constant 0 : index
    %26 = vector.load %arg9[%c0_17, %c0_18] : memref<1x128xf32, #tpu.memory_space<vmem>>, vector<1x128xf32>
    tpu.vector_store %arg9[%c0_17, %c0_18], %11 {strides = array<i32>} : memref<1x128xf32, #tpu.memory_space<vmem>>, vector<1x128xf32>,
    %c0_i32_19 = arith.constant 0 : i32
    %27 = arith.cmpi eq, %arg2, %c0_i32_19 : i32
    %28 = arith.extui %27 : i1 to i32
    %c0_i32_20 = arith.constant 0 : i32
    %29 = arith.cmpi ne, %28, %c0_i32_20 : i32
    scf.if %29 {
      %c32 = arith.constant 32 : index
      %c0_21 = arith.constant 0 : index
      %30 = vector.load %arg10[%c32, %c0_21] : memref<48x128xf32, #tpu.memory_space<vmem>>, vector<1x128xf32>
      %31 = tpu.reciprocal %30 : vector<1x128xf32> -> vector<1x128xf32>
      %c0_22 = arith.constant 0 : index
      %32 = memref.load %arg7[%c0_22] : memref<1xf32, #tpu.memory_space<smem>>
      %c0_23 = arith.constant 0 : index
      %c0_24 = arith.constant 0 : index
      %33 = vector.load %arg10[%c0_23, %c0_24] : memref<48x128xf32, #tpu.memory_space<vmem>>, vector<32x128xf32>
      %34 = vector.broadcast %31 : vector<1x128xf32> to vector<32x128xf32>
      %35 = arith.mulf %33, %34 : vector<32x128xf32>
      %36 = vector.broadcast %32 : f32 to vector<32x128xf32>
      %37 = arith.mulf %36, %35 : vector<32x128xf32>
      %c0_25 = arith.constant 0 : index
      %c0_26 = arith.constant 0 : index
      %c0_27 = arith.constant 0 : index
      %38 = vector.load %arg4[%c0_25, %c0_26, %c0_27] : memref<1x32x128xf32, #tpu.memory_space<vmem>>, vector<1x32x128xf32>
      %39 = vector.shape_cast %38 : vector<1x32x128xf32> to vector<32x128xf32>
      %40 = arith.addf %37, %39 : vector<32x128xf32>
      %c0_28 = arith.constant 0 : index
      %c0_29 = arith.constant 0 : index
      %c0_30 = arith.constant 0 : index
      %41 = vector.load %arg8[%c0_28, %c0_29, %c0_30] : memref<1x32x128xf32, #tpu.memory_space<vmem>>, vector<1x32x128xf32>
      %42 = vector.shape_cast %41 : vector<1x32x128xf32> to vector<32x128xf32>
      %43 = vector.shape_cast %40 : vector<32x128xf32> to vector<1x32x128xf32>
      tpu.vector_store %arg8[%c0_28, %c0_29, %c0_30], %43 {strides = array<i32>} : memref<1x32x128xf32, #tpu.memory_space<vmem>>, vector<1x32x128xf32>,
    } else {
    }
    return
  }
  func.func @transform_0(%arg0: i32, %arg1: i32, %arg2: i32) -> (i32, i32, i32) {
    %c0_i32 = arith.constant 0 : i32
    %c0_i32_0 = arith.constant 0 : i32
    return %arg0, %c0_i32, %arg1 : i32, i32, i32
  }
  func.func @transform_1(%arg0: i32, %arg1: i32, %arg2: i32) -> (i32, i32, i32) {
    %c0_i32 = arith.constant 0 : i32
    %c0_i32_0 = arith.constant 0 : i32
    return %arg0, %c0_i32, %arg1 : i32, i32, i32
  }
  func.func @transform_2(%arg0: i32, %arg1: i32, %arg2: i32) -> (i32, i32, i32) {
    %c0_i32 = arith.constant 0 : i32
    %c0_i32_0 = arith.constant 0 : i32
    return %arg0, %c0_i32, %arg2 : i32, i32, i32
  }
  func.func @transform_3(%arg0: i32, %arg1: i32, %arg2: i32) -> (i32, i32, i32) {
    %c0_i32 = arith.constant 0 : i32
    %c0_i32_0 = arith.constant 0 : i32
    return %arg0, %c0_i32, %arg2 : i32, i32, i32
  }
  func.func @transform_4(%arg0: i32, %arg1: i32, %arg2: i32) -> i32 {
    %c0_i32 = arith.constant 0 : i32
    %c0_i32_0 = arith.constant 0 : i32
    return %c0_i32 : i32
  }
  func.func @transform_5(%arg0: i32, %arg1: i32, %arg2: i32) -> (i32, i32, i32) {
    %c0_i32 = arith.constant 0 : i32
    %c0_i32_0 = arith.constant 0 : i32
    return %arg0, %c0_i32, %arg1 : i32, i32, i32
  }
}

</mosaic_0001>

<bundles_post_ra>
// kernel: tpu_custom_call.1
= control target key start
LH: loop header
LB: loop body
LE: loop exit
PB: predicated region body
PF: predicated region fallthrough
CT: control target
= control target key end

     0   :  { %s2558_s0 = inlined_call_operand.hbm [shape: bf16[2,48,256], index: 0, kind: input, shape index: {}]   ;;  %s2559_s1 = inlined_call_operand.hbm [shape: f32[2,32,256], index: 1, kind: input, shape index: {}]   ;;  %s2560_s2 = inlined_call_operand.hbm [shape: bf16[2,48,256], index: 2, kind: input, shape index: {}]   ;;  %s2561_s3 = inlined_call_operand.hbm [shape: bf16[2,48,256], index: 3, kind: input, shape index: {}]   ;;  %s2562_s4 = inlined_call_operand.<no memory space> [shape: f32[1], index: 4, kind: input, shape index: {}]   ;;  %s2563_s5 = inlined_call_operand.hbm [shape: f32[2,32,256], index: 5, kind: output, shape index: {}]  }
   0x1   :  { %2578 = sst [smem:[#allocation28_spill]] %s2559_s1 }
   0x2   :  { %2579 = sst [smem:[#allocation29_spill]] %s2563_s5 }
   0x3   :  { %10 = sst [smem:[#allocation4]] %s2562_s4 }
   0x4   :  { %11 = vsyncpa [#allocation6], 0 }
   0x5   :  { %13 = vsyncpa [#allocation6 + $0x1], 0 }
   0x6   :  { %14 = vsyncpa [#allocation9], 0 }
   0x7   :  { %16 = vsyncpa [#allocation9 + $0x1], 0 }
   0x8   :  { %17 = vsyncpa [#allocation12], 0 }
   0x9   :  { %19 = vsyncpa [#allocation12 + $0x1], 0 }
   0xa   :  { %20 = vsyncpa [#allocation7], 0 }
   0xb   :  { %22 = vsyncpa [#allocation7 + $0x1], 0  ;;  %s1879_s20 = smov 0   ;;  %s1881_s21 = smov 0  }
   0xc   :  { %s1883_s22 = smov 0   ;;  %s1885_s23 = smov 0  }
   0xd   :  { %s1887_s24 = smov 0   ;;  %s1889_s25 = smov 0  }
   0xe   :  { %s1891_s4 = smov 0   ;;  %s1893_s26 = smov 0  }
   0xf   :  { %s1895_s27 = smov 0   ;;  %s1897_s28 = smov 0  }
  0x10   :  { %s1899_s29 = smov 0  }
  0x11 LB: > { %2580 = sst [smem:[#allocation19_spill]] %s1802_s23  ;;  %s1935_s30 = sadd.s32 4294967295, %s1830_s29   ;;  %s1830_s29 = sphi %s1899_s29, %s28_s29   ;;  %s1826_s28 = sphi %s1897_s28, %s2624_s28   ;;  %s1822_s27 = sphi %s1895_s27, %s2623_s27   ;;  %s1818_s26 = sphi %s1893_s26, %s2622_s26   ;;  %s1814_s4 = sphi %s1891_s4, %s2621_s4   ;;  %s1810_s25 = sphi %s1889_s25, %s2613_s25   ;;  %s1806_s24 = sphi %s1887_s24, %s2620_s24   ;;  %s1802_s23 = sphi %s1885_s23, %s2619_s23   ;;  %s1798_s22 = sphi %s1883_s22, %s2618_s22   ;;  %s1794_s21 = sphi %s1881_s21, %s2617_s21   ;;  %s1790_s20 = sphi %s1879_s20, %s2616_s20  }
  0x12   : > { %2581 = sst [smem:[#allocation20_spill]] %s1810_s25  ;;  %s1212_s6 = sadd.s32 4294967294, %s1830_s29  }
  0x13   : > { %2582 = sst [smem:[#allocation21_spill]] %s1814_s4  ;;  %s43_s7 = sadd.s32 1, %s1822_s27 }
  0x14   : > { %2583 = sst [smem:[#allocation22_spill]] %s1818_s26  ;;  %s47_s8 = sadd.s32 1, %s1826_s28 }
  0x15   : > { %p45_p0 = scmp.ge.s32.totalorder %s43_s7, 2  ;;  %s56_s9 = sadd.s32 1, %s1810_s25 }
  0x16   : > { %p63_p1 = scmp.ne.s32.totalorder %s1810_s25, %s1806_s24  ;;  %p2572_p2 = scmp.eq.s32.totalorder %s1830_s29, 0 }
  0x17   : > { %s2626_s7 = smov (%p45_p0, %s43_s7), 0  ;;  %s2628_s8 = smov (!%p45_p0, %s47_s8), %s1826_s28 }
  0x18   : > { %2584 = sst [smem:[#allocation23_spill]] %s2626_s7  ;;  %s52_s10 = ssub.s32 %s1822_s27, %s2626_s7 }
  0x19   : > { %p1951_p3 = por %p2572_p2, %p63_p1  ;;  %p49_p4 = scmp.ge.s32.totalorder %s2628_s8, 2 }
  0x1a   : > { %p69_p5 = scmp.ne.s32.totalorder %s1806_s24, %s1802_s23  ;;  %p2571_p6 = scmp.eq.s32.totalorder %s1935_s30, 0 }
  0x1b   : > { %p200_p7 = scmp.eq.s32.totalorder %s1935_s30, 3  ;;  %s2630_s8 = smov (%p49_p4, %s2628_s8), 0 }
  0x1c   : > { %2586 = sst [smem:[#allocation24_spill]] %s2630_s8  ;;  %p1963_p8 = por %p2571_p6, %p69_p5 }
  0x1d   : > { %p1967_p9 = por %p200_p7, %p63_p1  ;;  %s1973_s14 = ssub.s32 %s1826_s28, %s2630_s8 }
  0x1e   : > { %s2587_s12 = scalar_select %p1963_p8, 1, 0 }
  0x1f   : > { %s2588_s13 = scalar_select %p1967_p9, 1, 0 }
  0x20   : > { %p206_p10 = scmp.eq.s32.totalorder %s1212_s6, 3  ;;  %s53_s15 = sor.u32 %s52_s10, %s1973_s14 }
  0x21   : > { %2589 = sst [smem:[#allocation25_spill]] %s2588_s13  ;;  %p54_p12 = scmp.eq.s32.totalorder %s53_s15, 0 }
  0x22   : > { %p1977_p13 = por %p206_p10, %p69_p5  ;;  %p2570_p0 = scmp.lt.s32.totalorder %s1830_s29, 4 }
  0x23   : > { %s1983_s17 = scalar_select %p54_p12, %s1810_s25, %s56_s9  }
  0x24   : > { %s2590_s16 = scalar_select %p1977_p13, 1, 0 }
  0x25   : > { %2592 = sst [smem:[#allocation27_spill]] %s1983_s17  ;;  %s1986_s18 = sand.u32 1, %s1810_s25  }
  0x26   : > { %2591 = sst [smem:[#allocation26_spill]] %s2590_s16  ;;  %p1992_p1 = pnand %p2570_p0, %p1951_p3 }
  0x27   : > { %s251_s6 = sand.u32 1, %s1830_s29   ;;  %s1216_s10 = sshll.u32 %s1986_s18, 5 }
  0x28   : > { %s1217_s15 = sshll.u32 %s1826_s28, 3  ;;  %s255_s16 = scalar_lea.vmem [#allocation8], %s1216_s10 }
  0x29   : > { %s260_s8 = sadd.s32 %s1822_s27, %s1217_s15  ;;  %s263_s23 = sshll.u32 %s255_s16, 4  ;;  %s2005_s23 = int_to_ptr.vmem [resolvable:$true] %s263_s23 }
  0x2a   : > { %s1218_s7 = sshll.u32 %s260_s8, 7  ;;  %s2594_s1 = sld [smem:[#allocation28_spill]] }
  0x2b   : > { %s2007_s11 = scalar_lea.sflag [#allocation9], %s251_s6  ;;  %p1578_p4 = pneg %p1992_p1 }
  0x30   : > { %s2003_s25 = scalar_lea.hbm %s2594_s1, %s1218_s7  ;;  %s1581_s7 = scalar_lea.hbm %s2594_s1, 2048 }
  0x31   : > { %s1576_s5 = scalar_lea.hbm %s2003_s25, 512  ;;  %p1582_p10 = scmp.lt.u32.totalorder %s2003_s25, %s2594_s1 }
  0x32   : > { %p1577_p3 = scmp.ne.s32.totalorder %s2003_s25, %s1576_s5  ;;  %p1583_p12 = scmp.lt.u32.totalorder %s1581_s7, %s1576_s5 }
  0x33   : > { %p1585_p6 = scmp.lt.u32.totalorder %s1576_s5, %s2003_s25 }
  0x34   : > { %p1579_p5 = pnand %p1578_p4, %p1577_p3  ;;  %p1584_p0 = por %p1583_p12, %p1582_p10 }
  0x36   : > { %p1580_p7 = pneg %p1579_p5  ;;  %p1586_p2 = por %p1585_p6, %p1584_p0 }
  0x38   : > { %p1587_p11 = pnand %p1586_p2, %p1580_p7 }
  0x3a   : > { %1590 = shalt.err (!%p1587_p11)
}
  0x3b   : > { %s1591_s6 = scalar_lea.vmem %s2005_s23, 512  ;;  %s1832_s15 = smov [#allocation8]  }
  0x3c   : > { %p1592_p3 = scmp.ne.s32.totalorder %s2005_s23, %s1591_s6  ;;  %s1596_s9 = sshll.u32 %s1832_s15, 4  ;;  %s1597_s9 = int_to_ptr.vmem [resolvable:$false] %s1596_s9 }
  0x3d   : > { %s1598_s8 = scalar_lea.vmem %s1597_s9, 1024  ;;  %p1599_p9 = scmp.lt.s32.totalorder %s2005_s23, %s1597_s9 }
  0x3e   : > { %p1594_p5 = pnand %p1592_p3, %p1578_p4  ;;  %p1600_p10 = scmp.lt.s32.totalorder %s1598_s8, %s1591_s6 }
  0x40   : > { %p1595_p13 = pneg %p1594_p5  ;;  %p1601_p12 = por %p1600_p10, %p1599_p9 }
  0x42   : > { %p1602_p6 = pnand %p1601_p12, %p1595_p13 }
  0x44   : > { %1605 = shalt.err (!%p1602_p6)
}
  0x45   : > { %s1833_s5 = smov 256   ;;  %s1834_s16 = smov 128  }
  0x46   : > { %s1835_s7 = smov 8   ;;  %p1221_p2 = scmp.ge.s32.totalorder %s1830_s29, 1 }
  0x47   : > { %1375 = dma.hbm_to_vmem [thread:$0]  (!%p1992_p1), %s2003_s25, 512, %s2005_s23, %s2007_s11, %s1833_s5, %s1834_s16, %s1835_s7  }
  0x48   : > { %p317_p9 = scmp.lt.s32.totalorder %s1830_s29, 5  ;;  %s1351_s10 = smul.u32 24, %s1986_s18 }
  0x49   : > { %s1352_s6 = smul.u32 12, %s1826_s28  ;;  %s230_s23 = scalar_lea.sflag [#allocation6], %s1986_s18 }
  0x4a   : > { %p2039_p11 = pnand %p1221_p2, %p317_p9  ;;  %s233_s9 = scalar_lea.vmem [#allocation5], %s1351_s10 }
  0x4b   : > { %s238_s15 = sadd.s32 %s1822_s27, %s1352_s6  ;;  %s241_s8 = sshll.u32 %s233_s9, 4  ;;  %s2046_s8 = int_to_ptr.vmem [resolvable:$true] %s241_s8 }
  0x4c   : > { %s1215_s1 = sshll.u32 %s238_s15, 6  ;;  %s1611_s6 = scalar_lea.hbm %s2558_s0, 1536 }
  0x4d   : > { %s2051_s26 = scalar_lea.hbm %s2558_s0, %s1215_s1 }
  0x4e   : > { %s1606_s25 = scalar_lea.hbm %s2051_s26, 384  ;;  %p1612_p3 = scmp.lt.u32.totalorder %s2051_s26, %s2558_s0 }
  0x4f   : > { %p1607_p13 = scmp.ne.s32.totalorder %s2051_s26, %s1606_s25  ;;  %p1613_p5 = scmp.lt.u32.totalorder %s1611_s6, %s1606_s25 }
  0x50   : > { %p1615_p12 = scmp.lt.u32.totalorder %s1606_s25, %s2051_s26 }
  0x51   : > { %p1609_p0 = pnand %p1607_p13, %p1578_p4  ;;  %p1614_p10 = por %p1613_p5, %p1612_p3 }
  0x53   : > { %p1610_p7 = pneg %p1609_p0  ;;  %p1616_p6 = por %p1615_p12, %p1614_p10 }
  0x55   : > { %p1617_p2 = pnand %p1616_p6, %p1610_p7 }
  0x57   : > { %1620 = shalt.err (!%p1617_p2)
}
  0x58   : > { %s1621_s1 = scalar_lea.vmem %s2046_s8, 384  ;;  %s1836_s4 = smov [#allocation5]  }
  0x59   : > { %p1622_p9 = scmp.ne.s32.totalorder %s2046_s8, %s1621_s1  ;;  %s1626_s13 = sshll.u32 %s1836_s4, 4  ;;  %s1627_s13 = int_to_ptr.vmem [resolvable:$false] %s1626_s13 }
  0x5a   : > { %s1628_s5 = scalar_lea.vmem %s1627_s13, 768  ;;  %p1629_p8 = scmp.lt.s32.totalorder %s2046_s8, %s1627_s13 }
  0x5b   : > { %p1624_p13 = pnand %p1622_p9, %p1578_p4  ;;  %p1630_p3 = scmp.lt.s32.totalorder %s1628_s5, %s1621_s1 }
  0x5d   : > { %p1625_p0 = pneg %p1624_p13  ;;  %p1631_p5 = por %p1630_p3, %p1629_p8 }
  0x5f   : > { %p1632_p10 = pnand %p1631_p5, %p1625_p0 }
  0x61   : > { %1635 = shalt.err (!%p1632_p10)
}
  0x62   : > { %s1837_s25 = smov 64   ;;  %s1838_s10 = smov 4  }
  0x63   : > { %1372 = dma.hbm_to_vmem [thread:$0]  (!%p1992_p1), %s2051_s26, 384, %s2046_s8, %s230_s23, %s1834_s16, %s1837_s25, %s1838_s10  }
  0x64   : > { %s112_s6 = sadd.s32 1, %s1798_s22  ;;  %p119_p8 = scmp.ne.s32.totalorder %s1798_s22, %s1794_s21 }
  0x65   : > { %p2596_p4 = scmp.eq.s32.totalorder %s1973_s14, 0  ;;  %p2597_p7 = scmp.eq.s32.totalorder %s1830_s29, 0 }
  0x66   : > { %p125_p6 = scmp.ne.s32.totalorder %s1794_s21, %s1790_s20  ;;  %s275_s9 = sand.u32 1, %s1798_s22  }
  0x67   : > { %s2086_s15 = scalar_select %p2596_p4, %s1798_s22, %s112_s6  }
  0x68   : > { %p121_p12 = por %p119_p8, %p2597_p7  ;;  %s1354_s1 = smul.u32 768, %s1826_s28 }
  0x69   : > { %p2598_p2 = scmp.eq.s32.totalorder %s1935_s30, 0  ;;  %s2102_s19 = smul.u32 48, %s275_s9 }
  0x6a   : > { %s2109_s14 = scalar_lea.hbm %s2560_s2, %s1354_s1  ;;  %p2600_p1 = scmp.lt.s32.totalorder %s1830_s29, 4 }
  0x6b   : > { %p2096_p9 = por %p125_p6, %p2598_p2  ;;  %s277_s8 = scalar_lea.vmem [#allocation10], %s2102_s19 }
  0x6c   : > { %p2113_p13 = pnand %p2600_p1, %p121_p12  ;;  %s286_s23 = sshll.u32 %s277_s8, 4  ;;  %s2118_s23 = int_to_ptr.vmem [resolvable:$true] %s286_s23 }
  0x6d   : > { %s2599_s4 = scalar_select %p2096_p9, 1, 0 }
  0x6e   : > { %s1636_s13 = scalar_lea.hbm %s2109_s14, 768  ;;  %p1638_p3 = pneg %p2113_p13 }
  0x6f   : > { %p1637_p0 = scmp.ne.s32.totalorder %s2109_s14, %s1636_s13  ;;  %s1641_s10 = scalar_lea.hbm %s2560_s2, 1536 }
  0x70   : > { %p1642_p8 = scmp.lt.u32.totalorder %s2109_s14, %s2560_s2  ;;  %p1643_p4 = scmp.lt.u32.totalorder %s1641_s10, %s1636_s13 }
  0x71   : > { %p1639_p5 = pnand %p1638_p3, %p1637_p0  ;;  %p1645_p12 = scmp.lt.u32.totalorder %s1636_s13, %s2109_s14 }
  0x72   : > { %p1644_p7 = por %p1643_p4, %p1642_p8 }
  0x73   : > { %p1640_p10 = pneg %p1639_p5 }
  0x74   : > { %p1646_p6 = por %p1645_p12, %p1644_p7 }
  0x76   : > { %p1647_p2 = pnand %p1646_p6, %p1640_p10 }
  0x78   : > { %1650 = shalt.err (!%p1647_p2)
}
  0x79   : > { %s1651_s18 = scalar_lea.vmem %s2118_s23, 768  ;;  %s1839_s8 = smov [#allocation10]  }
  0x7a   : > { %p1652_p1 = scmp.ne.s32.totalorder %s2118_s23, %s1651_s18  ;;  %s1656_s5 = sshll.u32 %s1839_s8, 4  ;;  %s1657_s5 = int_to_ptr.vmem [resolvable:$false] %s1656_s5 }
  0x7b   : > { %s1658_s25 = scalar_lea.vmem %s1657_s5, 1536  ;;  %p1659_p9 = scmp.lt.s32.totalorder %s2118_s23, %s1657_s5 }
  0x7c   : > { %p1654_p0 = pnand %p1652_p1, %p1638_p3  ;;  %p1660_p8 = scmp.lt.s32.totalorder %s1658_s25, %s1651_s18 }
  0x7e   : > { %p1655_p5 = pneg %p1654_p0  ;;  %p1661_p4 = por %p1660_p8, %p1659_p9 }
  0x80   : > { %p1662_p7 = pnand %p1661_p4, %p1655_p5 }
  0x82   : > { %1665 = shalt.err (!%p1662_p7)
}
  0x83   : > { %1378 = dma.hbm_to_vmem [thread:$0]  (!%p2113_p13), %s2109_s14, 768, %s2118_s23, %s2007_s11, %s1834_s16, %s1834_s16, %s1835_s7  }
  0x84   : > { %s2154_s6 = scalar_lea.hbm %s2561_s3, %s1354_s1  ;;  %s300_s26 = scalar_lea.vmem [#allocation11], %s2102_s19 }
  0x85   : > { %s309_s18 = sshll.u32 %s300_s26, 4  ;;  %s2161_s8 = scalar_lea.sflag [#allocation12], %s275_s9  ;;  %s2157_s18 = int_to_ptr.vmem [resolvable:$true] %s309_s18 }
  0x86   : > { %s1666_s5 = scalar_lea.hbm %s2154_s6, 768  ;;  %s1671_s14 = scalar_lea.hbm %s2561_s3, 1536 }
  0x87   : > { %p1667_p9 = scmp.ne.s32.totalorder %s2154_s6, %s1666_s5  ;;  %p1672_p6 = scmp.lt.u32.totalorder %s2154_s6, %s2561_s3 }
  0x88   : > { %p1673_p2 = scmp.lt.u32.totalorder %s1671_s14, %s1666_s5  ;;  %p1675_p0 = scmp.lt.u32.totalorder %s1666_s5, %s2154_s6 }
  0x89   : > { %p1669_p10 = pnand %p1667_p9, %p1638_p3 }
  0x8a   : > { %p1674_p1 = por %p1673_p2, %p1672_p6 }
  0x8b   : > { %p1670_p12 = pneg %p1669_p10 }
  0x8c   : > { %p1676_p5 = por %p1675_p0, %p1674_p1 }
  0x8e   : > { %p1677_p8 = pnand %p1676_p5, %p1670_p12 }
  0x90   : > { %1680 = shalt.err (!%p1677_p8)
}
  0x91   : > { %s1681_s9 = scalar_lea.vmem %s2157_s18, 768  ;;  %s1840_s19 = smov [#allocation11]  }
  0x92   : > { %p1682_p4 = scmp.ne.s32.totalorder %s2157_s18, %s1681_s9  ;;  %s1686_s13 = sshll.u32 %s1840_s19, 4  ;;  %s1687_s13 = int_to_ptr.vmem [resolvable:$false] %s1686_s13 }
  0x93   : > { %s1688_s10 = scalar_lea.vmem %s1687_s13, 1536  ;;  %p1689_p10 = scmp.lt.s32.totalorder %s2157_s18, %s1687_s13 }
  0x94   : > { %p1684_p7 = pnand %p1682_p4, %p1638_p3  ;;  %p1690_p6 = scmp.lt.s32.totalorder %s1688_s10, %s1681_s9 }
  0x96   : > { %p1685_p9 = pneg %p1684_p7  ;;  %p1691_p2 = por %p1690_p6, %p1689_p10 }
  0x98   : > { %p1692_p1 = pnand %p1691_p2, %p1685_p9 }
  0x9a   : > { %1695 = shalt.err (!%p1692_p1)
}
  0x9b   : > { %1381 = dma.hbm_to_vmem [thread:$0]  (!%p2113_p13), %s2154_s6, 768, %s2157_s18, %s2161_s8, %s1834_s16, %s1834_s16, %s1835_s7  }
  0x9c   : > { %321 = sbr.rel (%p2039_p11) target bundleno = 924 (0x39c), region = 40  ;;  %s2193_s26 = sand.u32 (!%p2039_p11), 1, %s1806_s24  }
  0x9d   : > { %s1357_s5 = smul.u32 (!%p2039_p11), 24, %s2193_s26  ;;  %s324_s11 = scalar_lea.sflag (!%p2039_p11), [#allocation6], %s2193_s26 }
  0x9e   : > { %p2602_p3 = scmp.ne.s32.totalorder (!%p2039_p11), %s2587_s12, 0 }
  0x9f   : > { %s327_s1 = scalar_lea.vmem (!%p2039_p11), [#allocation5], %s1357_s5 }
  0xa3   : > { %1769 = dma.done.wait (%p2602_p3), %s324_s11, 384  }
  0xa4   : > { %1771 = vsyncadd (%p2602_p3), %s324_s11, 4294966912  ;;  %s332_s16 = sand.u32 1, %s1935_s30   ;;  %s1222_s7 = sshll.u32 %s2193_s26, 5 }
  0xa5   : > { %s333_s17 = scalar_lea.sflag [#allocation9], %s332_s16  ;;  %s2205_s20 = scalar_lea.vmem [#allocation8], %s1222_s7 }
  0xa6   : > { %1773 = dma.done.wait (%p2602_p3), %s333_s17, 512  }
  0xa7   : > { %1775 = vsyncadd (%p2602_p3), %s333_s17, 4294966784  ;;  %s343_s6 = sand.u32 1, %s1794_s21   ;;  %p2603_p11 = scmp.ne.s32.totalorder %s2599_s4, 0 }
  0xa8   : > { %s1358_s18 = smul.u32 48, %s343_s6 }
  0xaa   : > { %s345_s8 = scalar_lea.vmem [#allocation10], %s1358_s18 }
  0xab   : > { %1777 = dma.done.wait (%p2603_p11), %s333_s17, 768  }
  0xac   : > { %1779 = vsyncadd (%p2603_p11), %s333_s17, 4294966528  ;;  %s351_s30 = scalar_lea.sflag [#allocation12], %s343_s6  ;;  %s2216_s14 = scalar_lea.vmem [#allocation11], %s1358_s18 }
  0xad   : > { %1781 = dma.done.wait (%p2603_p11), %s351_s30, 768  }
  0xae   : > { %1783 = vsyncadd (%p2603_p11), %s351_s30, 4294966528  ;;  %v1487_v0 = vld [vmem:[%s345_s8] ss:$8 sps:$4 sm:$0xff]   ;;  %v1489_v1 = vld [vmem:[%s345_s8 + $0x10] ss:$8 sps:$4 sm:$0xff]   ;;  %vm502_vm0 = vcmask 392192  }
  0xaf   : > { %452 = vxpose.xlu0.c.b16.start [1/3] (short) %v1487_v0, 128  ;;  %v1493_v2 = vld [vmem:[%s345_s8 + $0x4] ss:$8 sps:$4 sm:$0xff]   ;;  %v1494_v3 = vld [vmem:[%s345_s8 + $0x14] ss:$8 sps:$4 sm:$0xff]   ;;  %v1491_v4 = vld [vmem:[%s345_s8 + $0x20] ss:$8 sps:$4 sm:$0xff]  }
  0xb0   : > { %v1496_v5 = vld [vmem:[%s327_s1] sm:$0xff]   ;;  %468 = vxpose.xlu1.c.b16.start [1/3] (short) %v1493_v2, 128  ;;  %v1497_v6 = vld [vmem:[%s327_s1 + $0x8] sm:$0xff]   ;;  %v1498_v7 = vld [vmem:[%s327_s1 + $0x10] sm:$0xff]   ;;  %v1841_v25 = vmov -inf   ;;  %s2604_s12 = sld [smem:[#allocation22_spill]]  ;;  %s2605_s4 = sld [smem:[#allocation21_spill]] }
  0xb1   : > { %1313 = vmatprep.subr.bf16.mxu0 %v1496_v5  ;;  %v1495_v8 = vld [vmem:[%s345_s8 + $0x24] ss:$8 sps:$4 sm:$0xff]   ;;  %403 = vst [vmem:[#allocation2] sm:$0x1] %v1841_v25  ;;  %s1001_s23 = sld [smem:[#allocation4]]  ;;  %s395_s19 = scalar_lea.vmem [#allocation13], %s1222_s7 }
  0xb2   : > { %1314 = vmatpush3.bf16.msra.mxu0 %v1496_v5  ;;  %v1501_v47 = vld [vmem:[%s2216_s14 + $0x4] ss:$8 sps:$4 sm:$0xff]   ;;  %s1046_s13 = sshll.u32 %s395_s19, 4  ;;  %s2606_s5 = sld [smem:[#allocation25_spill]]  ;;  %s2490_s13 = int_to_ptr.vmem [resolvable:$true] %s1046_s13 }
  0xb3   : > { %453 = vxpose.xlu0.c.b16.cont [2/3] (short) %v1489_v1, 128  ;;  %1315 = vmatprep.subr.bf16.mxu0 %v1497_v6  ;;  %s2607_s16 = sld [smem:[#allocation29_spill]]  ;;  %s1032_s17 = scalar_lea.sflag [#allocation7], %s2193_s26 }
  0xb4   : > { %469 = vxpose.xlu1.c.b16.cont [2/3] (short) %v1494_v3, 128  ;;  %958 = vmatprep.mubr.bf16.mxu1 %v1501_v47  ;;  %s1842_s6 = smov [#allocation13]  }
  0xb5   : > { %s1700_s18 = sshll.u32 %s1842_s6, 4  ;;  %s1701_s18 = int_to_ptr.vmem [resolvable:$false] %s1700_s18 }
  0xb6   : > { %1316 = vmatpush3.bf16.msra.mxu0 %v1497_v6  ;;  %s1256_s25 = sshll.u32 %s2604_s12, 3  ;;  %s1702_s8 = scalar_lea.vmem %s1701_s18, 1024 }
  0xb7   : > { %454 = vxpose.xlu0.c.b16.end [3/3] (short) %v1491_v4, 128  ;;  %1317 = vmatprep.subr.bf16.mxu0 %v1498_v7  ;;  %s1043_s9 = sadd.s32 %s2605_s4, %s1256_s25  ;;  %p1703_p8 = scmp.lt.s32.totalorder %s2490_s13, %s1701_s18 }
  0xb8   : > { %470 = vxpose.xlu1.c.b16.end [3/3] (short) %v1495_v8, 128  ;;  %s1257_s10 = sshll.u32 %s1043_s9, 7  ;;  %p2608_p12 = scmp.ne.s32.totalorder %s2606_s5, 0 }
  0xb9   : > { %s2495_s7 = scalar_lea.hbm %s2607_s16, %s1257_s10 }
  0xba   : > { %1318 = vmatpush3.bf16.msra.mxu0 %v1498_v7 }
 0x115   : > { %v460_v9 = vpop.trf.xlu0 }
 0x116   : > { %1319 = vmatprep.mubr.msk.bf16.mxu0 %vm502_vm0, %v460_v9  ;;  %v476_v13 = vpop.trf.xlu1 }
 0x119   : > { %v461_v10 = vpop.trf.xlu0 }
 0x11a   : > { %1320 = vmatmul.mubr.msk.bf16.vlgmr.msra.gmra.mrb[0].mxu0 %vm502_vm0, %v461_v10  ;;  %v477_v16 = vpop.trf.xlu1 }
 0x11d   : > { %v462_v11 = vpop.trf.xlu0 }
 0x11e   : > { %1323 = vmatprep.mubr.msk.bf16.mxu0 %vm502_vm0, %v462_v11  ;;  %v478_v18 = vpop.trf.xlu1 }
 0x121   : > { %v463_v12 = vpop.trf.xlu0 }
 0x122   : > { %1324 = vmatmul.mubr.msk.bf16.gmra.mrb[4].mxu0 %vm502_vm0, %v463_v12  ;;  %v479_v20 = vpop.trf.xlu1 }
 0x125   : > { %v464_v14 = vpop.trf.xlu0 }
 0x126   : > { %1327 = vmatprep.mubr.msk.bf16.mxu0 %vm502_vm0, %v464_v14  ;;  %v480_v21 = vpop.trf.xlu1 }
 0x129   : > { %v465_v15 = vpop.trf.xlu0 }
 0x12a   : > { %1328 = vmatmul.mubr.msk.bf16.gmra.mrb[8].mxu0 %vm502_vm0, %v465_v15  ;;  %v481_v22 = vpop.trf.xlu1 }
 0x12d   : > { %v466_v17 = vpop.trf.xlu0 }
 0x12e   : > { %1331 = vmatprep.mubr.msk.bf16.mxu0 %vm502_vm0, %v466_v17  ;;  %v482_v23 = vpop.trf.xlu1 }
 0x131   : > { %v467_v19 = vpop.trf.xlu0 }
 0x132   : > { %1332 = vmatmul.mubr.msk.bf16.gmra.mrb[12].mxu0 %vm502_vm0, %v467_v19  ;;  %v483_v24 = vpop.trf.xlu1 }
 0x133   : > { %1335 = vmatprep.mubr.msk.bf16.mxu0 %vm502_vm0, %v476_v13 }
 0x13a   : > { %1336 = vmatmul.mubr.msk.bf16.gmra.mrb[16].mxu0 %vm502_vm0, %v477_v16 }
 0x13b   : > { %1339 = vmatprep.mubr.msk.bf16.mxu0 %vm502_vm0, %v478_v18 }
 0x142   : > { %1340 = vmatmul.mubr.msk.bf16.gmra.mrb[20].mxu0 %vm502_vm0, %v479_v20 }
 0x143   : > { %1343 = vmatprep.mubr.msk.bf16.mxu0 %vm502_vm0, %v480_v21 }
 0x14a   : > { %1344 = vmatmul.mubr.msk.bf16.gmra.mrb[24].mxu0 %vm502_vm0, %v481_v22 }
 0x14b   : > { %1347 = vmatprep.mubr.msk.bf16.mxu0 %vm502_vm0, %v482_v23 }
 0x152   : > { %1348 = vmatmul.mubr.msk.bf16.gmra.mrb[28].mxu0 %vm502_vm0, %v483_v24 }
 0x1ed   : > { %v2238_v26 = vpop.f32.mrb[0].mxu0 }
 0x1ee   : > { %v2240_v27 = vpop.f32.mrb[1].mxu0 }
 0x1ef   : > { %v2242_v28 = vpop.f32.mrb[2].mxu0 }
 0x1f0   : > { %v2244_v29 = vpop.f32.mrb[3].mxu0 }
 0x1f5   : > { %v2246_v30 = vpop.f32.mrb[4].mxu0 }
 0x1f6   : > { %v715_v31 = vmax.f32 %v2238_v26, %v2246_v30  ;;  %v2250_v32 = vpop.f32.mrb[5].mxu0 }
 0x1f7   : > { %v713_v33 = vmax.f32 %v2240_v27, %v2250_v32  ;;  %v2254_v34 = vpop.f32.mrb[6].mxu0 }
 0x1f8   : > { %v716_v35 = vmax.f32 %v2242_v28, %v2254_v34  ;;  %v2258_v36 = vpop.f32.mrb[7].mxu0 }
 0x1f9   : > { %v714_v37 = vmax.f32 %v2244_v29, %v2258_v36 }
 0x1fd   : > { %v2262_v38 = vpop.f32.mrb[8].mxu0 }
 0x1fe   : > { %v719_v39 = vmax.f32 %v715_v31, %v2262_v38  ;;  %v2265_v40 = vpop.f32.mrb[9].mxu0 }
 0x1ff   : > { %v717_v41 = vmax.f32 %v713_v33, %v2265_v40  ;;  %v2268_v42 = vpop.f32.mrb[10].mxu0 }
 0x200   : > { %v720_v43 = vmax.f32 %v716_v35, %v2268_v42  ;;  %v2271_v44 = vpop.f32.mrb[11].mxu0  ;;  %v755_v35 = vlaneseq }
 0x201   : > { %v718_v45 = vmax.f32 %v714_v37, %v2271_v44 }
 0x205   : > { %v2274_v46 = vpop.f32.mrb[12].mxu0 }
 0x206   : > { %v723_v48 = vmax.f32 %v719_v39, %v2274_v46  ;;  %v2278_v49 = vpop.f32.mrb[13].mxu0 }
 0x207   : > { %v721_v50 = vmax.f32 %v717_v41, %v2278_v49  ;;  %v2281_v51 = vpop.f32.mrb[14].mxu0  ;;  %v756_v41 = vshrl.u32 %v755_v35, 7 }
 0x208   : > { %v724_v52 = vmax.f32 %v720_v43, %v2281_v51  ;;  %v2284_v53 = vpop.f32.mrb[15].mxu0 }
 0x209   : > { %v722_v54 = vmax.f32 %v718_v45, %v2284_v53  ;;  %v2332_v45 = vld [vmem:[#allocation2] sm:$0x1] }
 0x20d   : > { %v2287_v55 = vpop.f32.mrb[16].mxu0 }
 0x20e   : > { %v727_v56 = vmax.f32 %v723_v48, %v2287_v55  ;;  %v2290_v57 = vpop.f32.mrb[17].mxu0  ;;  %v2334_v48 = vsub.s32 0, %v756_v41 }
 0x20f   : > { %v725_v58 = vmax.f32 %v721_v50, %v2290_v57  ;;  %v2293_v59 = vpop.f32.mrb[18].mxu0 }
 0x210   : > { %v728_v60 = vmax.f32 %v724_v52, %v2293_v59  ;;  %v2296_v61 = vpop.f32.mrb[19].mxu0 }
 0x211   : > { %v726_v62 = vmax.f32 %v722_v54, %v2296_v61 }
 0x215   : > { %v2299_v63 = vpop.f32.mrb[20].mxu0 }
 0x216   : > { %v731_v0 = vmax.f32 %v727_v56, %v2299_v63  ;;  %v2302_v1 = vpop.f32.mrb[21].mxu0 }
 0x217   : > { %v729_v2 = vmax.f32 %v725_v58, %v2302_v1  ;;  %v2305_v3 = vpop.f32.mrb[22].mxu0 }
 0x218   : > { %v732_v4 = vmax.f32 %v728_v60, %v2305_v3  ;;  %v2308_v5 = vpop.f32.mrb[23].mxu0 }
 0x219   : > { %v730_v6 = vmax.f32 %v726_v62, %v2308_v5 }
 0x21d   : > { %v2311_v7 = vpop.f32.mrb[24].mxu0 }
 0x21e   : > { %v735_v8 = vmax.f32 %v731_v0, %v2311_v7  ;;  %v2314_v9 = vpop.f32.mrb[25].mxu0 }
 0x21f   : > { %v733_v10 = vmax.f32 %v729_v2, %v2314_v9  ;;  %v2317_v11 = vpop.f32.mrb[26].mxu0 }
 0x220   : > { %v736_v12 = vmax.f32 %v732_v4, %v2317_v11  ;;  %v2320_v13 = vpop.f32.mrb[27].mxu0 }
 0x221   : > { %v734_v14 = vmax.f32 %v730_v6, %v2320_v13 }
 0x225   : > { %v2323_v15 = vpop.f32.mrb[28].mxu0 }
 0x226   : > { %v739_v16 = vmax.f32 %v735_v8, %v2323_v15  ;;  %v2326_v17 = vpop.f32.mrb[29].mxu0 }
 0x227   : > { %v737_v18 = vmax.f32 %v733_v10, %v2326_v17  ;;  %v2329_v19 = vpop.f32.mrb[30].mxu0 }
 0x228   : > { %v740_v20 = vmax.f32 %v736_v12, %v2329_v19  ;;  %v700_v21 = vpop.f32.mrb[31].mxu0 }
 0x229   : > { %v738_v22 = vmax.f32 %v734_v14, %v700_v21 }
 0x22a   : > { %v742_v23 = vmax.f32 %v739_v16, %v740_v20 }
 0x22b   : > { %v741_v24 = vmax.f32 %v737_v18, %v738_v22 }
 0x22d   : > { %v743_v25 = vmax.f32 %v741_v24, %v742_v23 }
 0x22f   : > { %v744_v31 = vrot.slane %v743_v25, 4 }
 0x231   : > { %v745_v33 = vmax.f32 %v743_v25, %v744_v31 }
 0x233   : > { %v746_v37 = vrot.slane %v745_v33, 2 }
 0x235   : > { %v747_v39 = vmax.f32 %v745_v33, %v746_v37 }
 0x237   : > { %v748_v43 = vrot.slane %v747_v39, 1 }
 0x239   : > { %v749_v47 = vmax.f32 %v747_v39, %v748_v43 }
 0x23b   : > { %v2337_v50 = vmax.f32 %v2332_v45, %v749_v47 }
 0x23d   : > { %v751_v52 = vsub.f32 %v2332_v45, %v2337_v50  ;;  %v2343_v54 = vrot.slane %v2337_v50, %v2334_v48  ;;  %995 = vst [vmem:[#allocation2] sm:$0x1] %v2337_v50 }
 0x23f   : > { %v789_v56 = vsub.f32 %v700_v21, %v2343_v54  ;;  %v760_v58 = vsub.f32 %v2240_v27, %v2343_v54  ;;  %v761_v60 = vsub.f32 %v2244_v29, %v2343_v54  ;;  %v762_v62 = vsub.f32 %v2238_v26, %v2343_v54 }
 0x240   : > { %v763_v0 = vsub.f32 %v2242_v28, %v2343_v54  ;;  %v764_v2 = vsub.f32 %v2250_v32, %v2343_v54  ;;  %v765_v4 = vsub.f32 %v2258_v36, %v2343_v54  ;;  %v766_v6 = vsub.f32 %v2246_v30, %v2343_v54 }
 0x241   : > { %v767_v27 = vsub.f32 %v2254_v34, %v2343_v54  ;;  %v768_v29 = vsub.f32 %v2265_v40, %v2343_v54  ;;  %v769_v26 = vsub.f32 %v2271_v44, %v2343_v54  ;;  %v770_v28 = vsub.f32 %v2262_v38, %v2343_v54 }
 0x242   : > { %v771_v32 = vsub.f32 %v2268_v42, %v2343_v54  ;;  %v850_v8 = vmul.f32 1.442695, %v789_v56  ;;  %v772_v36 = vsub.f32 %v2278_v49, %v2343_v54  ;;  %v773_v30 = vsub.f32 %v2284_v53, %v2343_v54 }
 0x243   : > { %v774_v34 = vsub.f32 %v2274_v46, %v2343_v54  ;;  %v775_v40 = vsub.f32 %v2281_v51, %v2343_v54  ;;  %v776_v44 = vsub.f32 %v2290_v57, %v2343_v54  ;;  %v777_v38 = vsub.f32 %v2296_v61, %v2343_v54 }
 0x244   : > { %v778_v42 = vsub.f32 %v2287_v55, %v2343_v54  ;;  %v779_v49 = vsub.f32 %v2293_v59, %v2343_v54  ;;  %v780_v53 = vsub.f32 %v2302_v1, %v2343_v54  ;;  %v781_v46 = vsub.f32 %v2308_v5, %v2343_v54 }
 0x245   : > { %v782_v51 = vsub.f32 %v2299_v63, %v2343_v54  ;;  %v783_v57 = vsub.f32 %v2305_v3, %v2343_v54  ;;  %v784_v61 = vsub.f32 %v2314_v9, %v2343_v54  ;;  %v785_v55 = vsub.f32 %v2320_v13, %v2343_v54 }
 0x246   : > { %v786_v59 = vsub.f32 %v2311_v7, %v2343_v54  ;;  %v787_v1 = vsub.f32 %v2317_v11, %v2343_v54  ;;  %v788_v5 = vsub.f32 %v2326_v17, %v2343_v54  ;;  %v790_v10 = vsub.f32 %v2323_v15, %v2343_v54 }
 0x247   : > { %v791_v12 = vsub.f32 %v2329_v19, %v2343_v54  ;;  %v792_v14 = vmul.f32 1.442695, %v760_v58  ;;  %v794_v16 = vmul.f32 1.442695, %v761_v60  ;;  %v796_v18 = vmul.f32 1.442695, %v762_v62 }
 0x248   : > { %1508 = vpow2.f32 %v850_v8  ;;  %v798_v20 = vmul.f32 1.442695, %v763_v0  ;;  %v800_v21 = vmul.f32 1.442695, %v764_v2  ;;  %v802_v22 = vmul.f32 1.442695, %v765_v4 }
 0x249   : > { %1510 = vpow2.f32 %v792_v14  ;;  %v804_v23 = vmul.f32 1.442695, %v766_v6  ;;  %v806_v24 = vmul.f32 1.442695, %v767_v27  ;;  %v808_v25 = vmul.f32 1.442695, %v768_v29 }
 0x24a   : > { %1512 = vpow2.f32 %v794_v16  ;;  %v810_v31 = vmul.f32 1.442695, %v769_v26  ;;  %v812_v33 = vmul.f32 1.442695, %v770_v28  ;;  %v814_v35 = vmul.f32 1.442695, %v771_v32 }
 0x24b   : > { %1514 = vpow2.f32 %v796_v18  ;;  %v816_v37 = vmul.f32 1.442695, %v772_v36  ;;  %v818_v41 = vmul.f32 1.442695, %v773_v30  ;;  %v820_v47 = vmul.f32 1.442695, %v774_v34 }
 0x24c   : > { %1516 = vpow2.f32 %v798_v20  ;;  %v822_v58 = vmul.f32 1.442695, %v775_v40  ;;  %v824_v62 = vmul.f32 1.442695, %v776_v44  ;;  %v826_v4 = vmul.f32 1.442695, %v777_v38 }
 0x24d   : > { %1518 = vpow2.f32 %v800_v21  ;;  %v828_v27 = vmul.f32 1.442695, %v778_v42  ;;  %v830_v28 = vmul.f32 1.442695, %v779_v49  ;;  %v832_v8 = vmul.f32 1.442695, %v780_v53 }
 0x24e   : > { %1520 = vpow2.f32 %v802_v22  ;;  %v834_v34 = vmul.f32 1.442695, %v781_v46  ;;  %v836_v44 = vmul.f32 1.442695, %v782_v51  ;;  %v838_v49 = vmul.f32 1.442695, %v783_v57 }
 0x24f   : > { %1522 = vpow2.f32 %v804_v23  ;;  %v840_v46 = vmul.f32 1.442695, %v784_v61  ;;  %v842_v14 = vmul.f32 1.442695, %v785_v55  ;;  %v844_v3 = vmul.f32 1.442695, %v786_v59 }
 0x250   : > { %1524 = vpow2.f32 %v806_v24  ;;  %v846_v9 = vmul.f32 1.442695, %v787_v1  ;;  %v848_v13 = vmul.f32 1.442695, %v788_v5  ;;  %v852_v7 = vmul.f32 1.442695, %v790_v10 }
 0x251   : > { %1526 = vpow2.f32 %v808_v25  ;;  %v854_v11 = vmul.f32 1.442695, %v791_v12 }
 0x252   : > { %v2409_v39 = vpop.eup %1508  ;;  %1528 = vpow2.f32 %v810_v31 }
 0x253   : > { %v2411_v43 = vpop.eup %1510  ;;  %1530 = vpow2.f32 %v812_v33 }
 0x254   : > { %v2413_v56 = vpop.eup %1512  ;;  %1532 = vpow2.f32 %v814_v35 }
 0x255   : > { %v2415_v60 = vpop.eup %1514  ;;  %1534 = vpow2.f32 %v816_v37  ;;  %v856_v0 = vpack.c.bf16 %v2413_v56, %v2411_v43 }
 0x256   : > { %v2419_v2 = vpop.eup %1516  ;;  %1536 = vpow2.f32 %v818_v41 }
 0x257   : > { %v2421_v6 = vpop.eup %1518  ;;  %1538 = vpow2.f32 %v820_v47  ;;  %v857_v29 = vpack.c.bf16 %v2419_v2, %v2415_v60  ;;  %v1505_v2 = vld [vmem:[%s2216_s14 + $0x24] ss:$8 sps:$4 sm:$0xff]  }
 0x258   : > { %v2425_v26 = vpop.eup %1520  ;;  %1540 = vpow2.f32 %v822_v58 }
 0x259   : > { %v2427_v32 = vpop.eup %1522  ;;  %1542 = vpow2.f32 %v824_v62  ;;  %v858_v36 = vpack.c.bf16 %v2425_v26, %v2421_v6  ;;  %v1499_v62 = vld [vmem:[%s2216_s14] ss:$8 sps:$4 sm:$0xff]   ;;  %v752_v6 = vmul.f32 1.442695, %v751_v52 }
 0x25a   : > { %v2431_v30 = vpop.eup %1524  ;;  %1544 = vpow2.f32 %v826_v4  ;;  %v1507_v4 = vld [vmem:[%s2216_s14 + $0x20] ss:$8 sps:$4 sm:$0xff]  }
 0x25b   : > { %v2433_v40 = vpop.eup %1526  ;;  %1546 = vpow2.f32 %v828_v27  ;;  %v859_v38 = vpack.c.bf16 %v2431_v30, %v2427_v32 }
 0x25c   : > { %v2440_v42 = vpop.eup %1528  ;;  %1548 = vpow2.f32 %v830_v28 }
 0x25d   : > { %v1531_v53 = vpop.eup %1530  ;;  %1550 = vpow2.f32 %v832_v8  ;;  %v860_v63 = vpack.c.bf16 %v2440_v42, %v2433_v40 }
 0x25e   : > { %v1533_v51 = vpop.eup %1532  ;;  %1552 = vpow2.f32 %v834_v34 }
 0x25f   : > { %v1535_v16 = vpop.eup %1534  ;;  %1554 = vpow2.f32 %v836_v44  ;;  %v861_v57 = vpack.c.bf16 %v1533_v51, %v1531_v53 }
 0x260   : > { %v1537_v18 = vpop.eup %1536  ;;  %1556 = vpow2.f32 %v838_v49 }
 0x261   : > { %v1539_v61 = vpop.eup %1538  ;;  %1558 = vpow2.f32 %v840_v46  ;;  %v862_v55 = vpack.c.bf16 %v1537_v18, %v1535_v16 }
 0x262   : > { %v1541_v20 = vpop.eup %1540  ;;  %1560 = vpow2.f32 %v842_v14 }
 0x263   : > { %v1543_v59 = vpop.eup %1542  ;;  %1562 = vpow2.f32 %v844_v3  ;;  %v863_v1 = vpack.c.bf16 %v1541_v20, %v1539_v61 }
 0x264   : > { %v1545_v21 = vpop.eup %1544  ;;  %1564 = vpow2.f32 %v846_v9 }
 0x265   : > { %v1547_v22 = vpop.eup %1546  ;;  %1566 = vpow2.f32 %v848_v13  ;;  %v864_v17 = vpack.c.bf16 %v1545_v21, %v1543_v59  ;;  %v1014_v13 = vstv %s1001_s23  ;;  %v1021_v21 = vld [vmem:[%s2205_s20 + $0x10] sm:$0xff] }
 0x266   : > { %v1549_v5 = vpop.eup %1548  ;;  %1568 = vpow2.f32 %v852_v7 }
 0x267   : > { %v1551_v23 = vpop.eup %1550  ;;  %1570 = vpow2.f32 %v854_v11  ;;  %1279 = vmatprep.subr.bf16.mxu1 %v864_v17  ;;  %v865_v24 = vpack.c.bf16 %v1549_v5, %v1547_v22  ;;  %v1019_v11 = vld [vmem:[%s2205_s20] sm:$0xff]  ;;  %v1022_v22 = vld [vmem:[%s2205_s20 + $0x18] sm:$0xff] }
 0x268   : > { %v1553_v15 = vpop.eup %1552  ;;  %1280 = vmatpush3.bf16.msra.mxu1 %v856_v0  ;;  %v1502_v0 = vld [vmem:[%s2216_s14 + $0x14] ss:$8 sps:$4 sm:$0xff]   ;;  %1572 = vpow2.f32 %v752_v6 }
 0x269   : > { %v1555_v10 = vpop.eup %1554  ;;  %1281 = vmatprep.subr.bf16.mxu1 %v865_v24  ;;  %v866_v25 = vpack.c.bf16 %v1553_v15, %v1551_v23 }
 0x26a   : > { %v1557_v31 = vpop.eup %1556 }
 0x26b   : > { %v1559_v19 = vpop.eup %1558  ;;  %v867_v54 = vpack.c.bf16 %v1557_v31, %v1555_v10 }
 0x26c   : > { %v1561_v12 = vpop.eup %1560  ;;  %1282 = vmatpush3.bf16.msra.mxu1 %v857_v29 }
 0x26d   : > { %v1563_v33 = vpop.eup %1562  ;;  %1283 = vmatprep.subr.bf16.mxu1 %v866_v25  ;;  %v868_v35 = vpack.c.bf16 %v1561_v12, %v1559_v19 }
 0x26e   : > { %v1565_v37 = vpop.eup %1564 }
 0x26f   : > { %v1567_v41 = vpop.eup %1566  ;;  %v869_v43 = vpack.c.bf16 %v1565_v37, %v1563_v33 }
 0x270   : > { %v1569_v47 = vpop.eup %1568  ;;  %1284 = vmatpush3.bf16.msra.mxu1 %v858_v36  ;;  %v870_v56 = vpack.c.bf16 %v2409_v39, %v1567_v41  ;;  %v1504_v39 = vld [vmem:[%s2216_s14 + $0x10] ss:$8 sps:$4 sm:$0xff]  }
 0x271   : > { %v1571_v58 = vpop.eup %1570  ;;  %1285 = vmatprep.subr.bf16.mxu1 %v867_v54 }
 0x272   : > { %v871_v60 = vpack.c.bf16 %v1571_v58, %v1569_v47  ;;  %v1573_v27 = vpop.eup %1572 }
 0x273   : > { %v882_v29 = vrot.slane %v1573_v27, %v2334_v48 }
 0x274   : > { %1286 = vmatpush3.bf16.msra.mxu1 %v859_v38 }
 0x275   : > { %1287 = vmatprep.subr.bf16.mxu1 %v868_v35  ;;  %v884_v32 = vmul.f32 0.0, %v882_v29 }
 0x278   : > { %1288 = vmatpush3.bf16.msra.mxu1 %v860_v63 }
 0x279   : > { %1289 = vmatprep.subr.bf16.mxu1 %v869_v43 }
 0x27c   : > { %1290 = vmatpush3.bf16.msra.mxu1 %v861_v57 }
 0x27d   : > { %1291 = vmatprep.subr.bf16.mxu1 %v870_v56 }
 0x280   : > { %1292 = vmatpush3.bf16.msra.mxu1 %v862_v55 }
 0x281   : > { %1293 = vmatprep.subr.bf16.mxu1 %v871_v60 }
 0x284   : > { %1294 = vmatpush3.bf16.msra.mxu1 %v863_v1  ;;  %v1020_v1 = vld [vmem:[%s2205_s20 + $0x8] sm:$0xff]  ;;  %s1696_s20 = scalar_lea.vmem %s2490_s13, 512 }
 0x285   : > { %p1697_p13 = scmp.ne.s32.totalorder %s2490_s13, %s1696_s20  ;;  %p1704_p4 = scmp.lt.s32.totalorder %s1702_s8, %s1696_s20 }
 0x287   : > { %959 = vmatmul.mubr.bf16.vlgmr.msra.gmra.mrb[0].mxu1 %v1499_v62  ;;  %p1698_p0 = pnand %p1697_p13, %p2608_p12  ;;  %p1705_p7 = por %p1704_p4, %p1703_p8 }
 0x288   : > { %966 = vmatprep.mubr.bf16.mxu1 %v1502_v0 }
 0x289   : > { %p1699_p5 = pneg %p1698_p0 }
 0x28b   : > { %p1706_p9 = pnand %p1705_p7, %p1699_p5 }
 0x28f   : > { %967 = vmatmul.mubr.bf16.gmra.mrb[4].mxu1 %v1504_v39 }
 0x290   : > { %974 = vmatprep.mubr.bf16.mxu1 %v1505_v2 }
 0x297   : > { %975 = vmatmul.mubr.bf16.gmra.mrb[8].mxu1 %v1507_v4 }
 0x35a   : > { %v1295_v26 = vpop.f32.mrb[0].mxu1 }
 0x35b   : > { %v1296_v28 = vpop.f32.mrb[1].mxu1 }
 0x35c   : > { %v1297_v8 = vadd.f32 %v1296_v28, %v1295_v26  ;;  %v1298_v36 = vpop.f32.mrb[2].mxu1 }
 0x35d   : > { %v1299_v30 = vpop.f32.mrb[3].mxu1 }
 0x35e   : > { %v983_v34 = vadd.f32 %v1297_v8, %v884_v32  ;;  %v1300_v40 = vadd.f32 %v1299_v30, %v1298_v36 }
 0x360   : > { %v984_v44 = vadd.f32 %v1300_v40, %v884_v32 }
 0x362   : > { %v1301_v38 = vpop.f32.mrb[4].mxu1 }
 0x363   : > { %v1302_v42 = vpop.f32.mrb[5].mxu1 }
 0x364   : > { %v1303_v49 = vadd.f32 %v1302_v42, %v1301_v38  ;;  %v1304_v53 = vpop.f32.mrb[6].mxu1 }
 0x365   : > { %v1305_v45 = vpop.f32.mrb[7].mxu1 }
 0x366   : > { %v985_v50 = vadd.f32 %v1303_v49, %v884_v32  ;;  %v1306_v52 = vadd.f32 %v1305_v45, %v1304_v53 }
 0x368   : > { %v986_v46 = vadd.f32 %v1306_v52, %v884_v32 }
 0x36a   : > { %v1307_v63 = vpop.f32.mrb[8].mxu1 }
 0x36b   : > { %v1308_v51 = vpop.f32.mrb[9].mxu1 }
 0x36c   : > { %v1309_v14 = vadd.f32 %v1308_v51, %v1307_v63  ;;  %v1310_v16 = vpop.f32.mrb[10].mxu1 }
 0x36d   : > { %v1311_v3 = vpop.f32.mrb[11].mxu1 }
 0x36e   : > { %v987_v57 = vadd.f32 %v1309_v14, %v884_v32 }
 0x370   : > { %993 = vst [vmem:[#allocation3 + $0x20] sm:$0xff] %v987_v57 }
 0x377   : > { %v999_v18 = vld [vmem:[#allocation3 + $0x20] sm:$0x1] }
 0x378   : > { %1574 = vrcp.f32 %v999_v18 }
 0x382   : > { %v1575_v9 = vpop.eup %1574 }
 0x383   : > { %v1009_v61 = vrot.slane %v1575_v9, %v2334_v48 }
 0x385   : > { %v1010_v55 = vmul.f32 %v1009_v61, %v983_v34  ;;  %v1011_v20 = vmul.f32 %v1009_v61, %v984_v44  ;;  %v1012_v7 = vmul.f32 %v1009_v61, %v985_v50  ;;  %v1013_v59 = vmul.f32 %v1009_v61, %v986_v46 }
 0x387   : > { %v1015_v17 = vmul.f32 %v1014_v13, %v1010_v55  ;;  %v1016_v5 = vmul.f32 %v1014_v13, %v1011_v20  ;;  %v1017_v23 = vmul.f32 %v1014_v13, %v1012_v7  ;;  %v1018_v24 = vmul.f32 %v1014_v13, %v1013_v59 }
 0x389   : > { %v1023_v48 = vadd.f32 %v1019_v11, %v1015_v17  ;;  %v1024_v15 = vadd.f32 %v1020_v1, %v1016_v5  ;;  %v1025_v10 = vadd.f32 %v1021_v21, %v1017_v23  ;;  %v1026_v25 = vadd.f32 %v1022_v22, %v1018_v24 }
 0x38b   : > { %1027 = vst [vmem:[%s395_s19] sm:$0xff] %v1023_v48  ;;  %1028 = vst [vmem:[%s395_s19 + $0x8] sm:$0xff] %v1024_v15 }
 0x38c   : > { %1029 = vst [vmem:[%s395_s19 + $0x10] sm:$0xff] %v1025_v10  ;;  %1030 = vst [vmem:[%s395_s19 + $0x18] sm:$0xff] %v1026_v25 }
 0x38d   : > { %1709 = shalt.err (!%p1706_p9)
}
 0x38e   : > { %s1710_s30 = scalar_lea.hbm %s2495_s7, 512  ;;  %s1714_s4 = scalar_lea.hbm %s2607_s16, 2048 }
 0x38f   : > { %p1711_p10 = scmp.ne.s32.totalorder %s2495_s7, %s1710_s30  ;;  %p1715_p1 = scmp.lt.u32.totalorder %s2495_s7, %s2607_s16 }
 0x390   : > { %p1716_p3 = scmp.lt.u32.totalorder %s1714_s4, %s1710_s30  ;;  %p1718_p13 = scmp.lt.u32.totalorder %s1710_s30, %s2495_s7 }
 0x391   : > { %p1712_p6 = pnand %p1711_p10, %p2608_p12 }
 0x392   : > { %p1717_p11 = por %p1716_p3, %p1715_p1 }
 0x393   : > { %p1713_p2 = pneg %p1712_p6 }
 0x394   : > { %p1719_p0 = por %p1718_p13, %p1717_p11 }
 0x396   : > { %p1720_p5 = pnand %p1719_p0, %p1713_p2 }
 0x398   : > { %1723 = shalt.err (!%p1720_p5)
}
 0x399   : > { %s1843_s9 = smov 128   ;;  %s1844_s19 = smov 256  }
 0x39a   : > { %s1845_s10 = smov 8  }
 0x39b   : > { %1367 = dma.vmem_to_hbm [thread:$0]  (%p2608_p12), %s2490_s13, 512, %s2495_s7, %s1032_s17, %s1843_s9, %s1844_s19, %s1845_s10  }
 0x39c PF: > { %s2609_s11 = sld [smem:[#allocation19_spill]]  ;;  %s2610_s1 = sld [smem:[#allocation26_spill]] }
 0x39d   : > { %p1387_p8 = scmp.ge.s32.totalorder %s1830_s29, 2 }
 0x3a2   : > { %s1061_s20 = sand.u32 1, %s2609_s11   ;;  %p2611_p4 = scmp.ne.s32.totalorder %s2610_s1, 0 }
 0x3a3   : > { %s1062_s6 = scalar_lea.sflag [#allocation7], %s1061_s20 }
 0x3a4   : > { %p1383_p7 = pnand %p1387_p8, %p2611_p4 }
 0x3a6   : > { %1785 = dma.done.wait (!%p1383_p7), %s1062_s6, 512  }
 0x3a7   : > { %1787 = vsyncadd (!%p1383_p7), %s1062_s6, 4294966784  ;;  %s28_s29 = sadd.s32 1, %s1830_s29   ;;  %s2612_s26 = sld [smem:[#allocation20_spill]] }
 0x3a8   : > { %p25_p9 = scmp.ge.s32.totalorder %s28_s29, 6   ;;  %s2613_s25 = sld [smem:[#allocation27_spill]] }
 0x3a9   : > { %s2614_s13 = sld [smem:[#allocation23_spill]]  ;;  %s2615_s5 = sld [smem:[#allocation24_spill]] }
 0x3aa   : > { %s2616_s20 = smov %s1794_s21  ;;  %s2617_s21 = smov %s1798_s22 }
 0x3ab   : > { %s2618_s22 = smov %s2086_s15  ;;  %s2619_s23 = smov %s1806_s24 }
 0x3ac   : > { %s2621_s4 = smov %s1822_s27  ;;  %27 = sbr.rel (!%p25_p9) target bundleno = 17 (0x11), region = 130 }
 0x3ad   : > { %s2620_s24 = smov %s2612_s26  ;;  %s2622_s26 = smov %s1826_s28 }
 0x3af   : > { %s2623_s27 = smov %s2614_s13  ;;  %s2624_s28 = smov %s2615_s5 }
 0x3b3   :  { %1067 = vsyncpa [#allocation6], 1 }
 0x3b4   :  { %1069 = vsyncpa [#allocation6 + $0x1], 1 }
 0x3b5   :  { %1070 = vsyncpa [#allocation9], 1 }
 0x3b6   :  { %1072 = vsyncpa [#allocation9 + $0x1], 1 }
 0x3b7   :  { %1073 = vsyncpa [#allocation12], 1 }
 0x3b8   :  { %1075 = vsyncpa [#allocation12 + $0x1], 1 }
 0x3b9   :  { %1076 = vsyncpa [#allocation7], 1 }
 0x3ba   :  { %1078 = vsyncpa [#allocation7 + $0x1], 1 }

</bundles_post_ra>
